<compile_context>
chip_gen: v7x
topology: tpu7x:2x2x1
jax: 0.10.0
libtpu: 0.0.40
codegen_flags: <defaults>
</compile_context>

<pallas_src>
import jax
import jax.numpy as jnp
from jax import lax
from jax.experimental import pallas as pl
from jax.experimental.pallas import tpu as pltpu


def _src_classifier_kernel(x_ref, w_ref, b_ref, o_ref):
    x = x_ref[...]                       # (TM, dim_in), native dtype
    w = w_ref[...]                       # (dim_out, dim_in), nn.Linear layout

    # logits = x @ W^T + b  (contract dim_in of both operands on the MXU,
    # accumulate in f32).
    logits = lax.dot_general(
        x, w,
        dimension_numbers=(((1,), (1,)), ((), ())),
        preferred_element_type=jnp.float32,
    ) + b_ref[...].astype(jnp.float32)   # (TM, dim_out) f32

    # Numerically-stable softmax over the feature (last) axis == nn.Softmax(dim=1).
    m = jnp.max(logits, axis=-1, keepdims=True)
    e = jnp.exp(logits - m)
    denom = jnp.sum(e, axis=-1, keepdims=True)
    o_ref[...] = (e * pl.reciprocal(denom, approx=True)).astype(o_ref.dtype)


def source_classifier_forward(x, weight, bias, *, tm=None):
    """x: (B, dim_in); weight: (dim_out, dim_in) like nn.Linear; bias: (dim_out,)."""
    B, dim_in = x.shape
    dim_out, dim_in_w = weight.shape
    assert dim_in_w == dim_in, "weight must be (dim_out, dim_in)"
    b2d = bias.reshape(1, dim_out)

    xb = x.dtype.itemsize
    wb = weight.dtype.itemsize
    bb = bias.dtype.itemsize

    # Pick a batch tile: a multiple of 8 (sublane) when possible, sized so that
    # double-buffered x/out tiles + the resident weight fit comfortably inside
    # the most restrictive scoped-VMEM budget (v7x: 32 MiB default of 64 MiB).
    if tm is None:
        if B % 8 == 0:
            vmem_budget = 24 << 20  # leave headroom under the 32 MiB default
            resident = 2 * dim_in * dim_out * wb + 2 * dim_out * bb
            per_row = 2 * (dim_in + dim_out) * xb  # double-buffered x + out row
            rows = max((vmem_budget - resident) // max(per_row, 1), 8)
            tm = int(min(B, 1024, (rows // 8) * 8))
        else:
            tm = B  # full-extent block is always legal regardless of (8,128)
    grid = (pl.cdiv(B, tm),)

    # Explicit VMEM limit sized from the tiles actually used.
    vmem_needed = (
        2 * tm * dim_in * xb          # pipelined x tiles
        + 2 * tm * dim_out * xb       # pipelined out tiles
        + 2 * dim_in * dim_out * wb   # weight (conservatively double-buffered)
        + 2 * dim_out * bb            # bias
    )
    vmem_limit = int(min(max(2 * vmem_needed, 4 << 20), 100 << 20))

    cost = pl.CostEstimate(
        flops=2 * B * dim_in * dim_out,
        transcendentals=B * dim_out,
        bytes_accessed=(B * dim_in * xb
                        + dim_in * dim_out * wb
                        + dim_out * bb
                        + B * dim_out * xb),
    )

    return pl.pallas_call(
        _src_classifier_kernel,
        out_shape=jax.ShapeDtypeStruct((B, dim_out), x.dtype),
        grid=grid,
        in_specs=[
            pl.BlockSpec((tm, dim_in), lambda i: (i, 0)),        # x: tiled over batch
            pl.BlockSpec((dim_out, dim_in), lambda i: (0, 0)),   # weight: resident
            pl.BlockSpec((1, dim_out), lambda i: (0, 0)),        # bias: resident
        ],
        out_specs=pl.BlockSpec((tm, dim_out), lambda i: (i, 0)),
        compiler_params=pltpu.CompilerParams(
            dimension_semantics=("parallel",),   # rows independent -> megacore
            vmem_limit_bytes=vmem_limit,
        ),
        cost_estimate=cost,
    )(x, weight, b2d)


if __name__ == "__main__":
    key = jax.random.PRNGKey(0)
    B, dim_in, dim_out = 8, 32, 16

    k_x, k_w, k_b = jax.random.split(key, 3)
    x = jax.random.normal(k_x, (B, dim_in), dtype=jnp.float32)

    # Deterministic params mimicking nn.Linear default init: U(-1/sqrt(in), 1/sqrt(in)).
    bound = 1.0 / (dim_in ** 0.5)
    weight = jax.random.uniform(k_w, (dim_out, dim_in), jnp.float32, -bound, bound)
    bias = jax.random.uniform(k_b, (dim_out,), jnp.float32, -bound, bound)

    out = source_classifier_forward(x, weight, bias)
    out = jax.block_until_ready(out)

    # Sanity check against pure-JAX reference (tolerance loosened slightly for
    # the EUP approximate reciprocal used in the softmax normalization).
    ref = jax.nn.softmax(x @ weight.T + bias, axis=1)
    assert out.shape == (B, dim_out)
    assert jnp.allclose(out, ref, atol=2e-3, rtol=2e-3)
    assert jnp.allclose(jnp.sum(out, axis=1), 1.0, atol=5e-3)

    print("KERNEL_OK")
</pallas_src>

<mosaic_0001>
module attributes {stable_mosaic.version = 11 : i64} {
  func.func @_src_classifier_kernel(%arg0: i32, %arg1: memref<8x32xf32, #tpu.memory_space<vmem>>, %arg2: memref<16x32xf32, #tpu.memory_space<vmem>>, %arg3: memref<1x16xf32, #tpu.memory_space<vmem>>, %arg4: memref<8x16xf32, #tpu.memory_space<vmem>>) attributes {dimension_semantics = [#tpu.dimension_semantics<parallel>], iteration_bounds = array<i64: 1>, scalar_prefetch = 0 : i64, scratch_operands = 0 : i64, tpu.core_type = #tpu.core_type<tc>, window_params = [{transform_indices = @transform_0, window_bounds = array<i64: 8, 32>}, {pipeline_mode = #tpu.pipeline_mode<synchronous>, transform_indices = @transform_1, window_bounds = array<i64: 16, 32>}, {pipeline_mode = #tpu.pipeline_mode<synchronous>, transform_indices = @transform_2, window_bounds = array<i64: 1, 16>}, {transform_indices = @transform_3, window_bounds = array<i64: 8, 16>}]} {
    %c0 = arith.constant 0 : index
    %c0_0 = arith.constant 0 : index
    %0 = vector.load %arg1[%c0, %c0_0] : memref<8x32xf32, #tpu.memory_space<vmem>>, vector<8x32xf32>
    %c0_1 = arith.constant 0 : index
    %c0_2 = arith.constant 0 : index
    %1 = vector.load %arg2[%c0_1, %c0_2] : memref<16x32xf32, #tpu.memory_space<vmem>>, vector<16x32xf32>
    %cst = arith.constant dense<0.000000e+00> : vector<8x16xf32>
    %2 = tpu.matmul %0, %1, %cst {dimension_numbers = #tpu.dot_dimension_numbers<[1], [1], [0], [0], [0, 0, 1, 0], [], []>} : vector<8x32xf32>, vector<16x32xf32>, vector<8x16xf32> -> vector<8x16xf32>
    %c0_3 = arith.constant 0 : index
    %c0_4 = arith.constant 0 : index
    %3 = vector.load %arg3[%c0_3, %c0_4] : memref<1x16xf32, #tpu.memory_space<vmem>>, vector<1x16xf32>
    %4 = vector.broadcast %3 : vector<1x16xf32> to vector<8x16xf32>
    %5 = arith.addf %2, %4 : vector<8x16xf32>
    %cst_5 = arith.constant dense<0xFF800000> : vector<8xf32>
    %6 = vector.multi_reduction <maximumf>, %5, %cst_5 [1] : vector<8x16xf32> to vector<8xf32>
    %7 = vector.shape_cast %6 : vector<8xf32> to vector<8x1xf32>
    %8 = vector.broadcast %7 : vector<8x1xf32> to vector<8x16xf32>
    %9 = arith.subf %5, %8 : vector<8x16xf32>
    %10 = math.exp %9 : vector<8x16xf32>
    %cst_6 = arith.constant dense<0.000000e+00> : vector<8xf32>
    %11 = vector.multi_reduction <add>, %10, %cst_6 [1] : vector<8x16xf32> to vector<8xf32>
    %12 = vector.shape_cast %11 : vector<8xf32> to vector<8x1xf32>
    %13 = tpu.reciprocal %12 {approx = true} : vector<8x1xf32> -> vector<8x1xf32>
    %14 = vector.broadcast %13 : vector<8x1xf32> to vector<8x16xf32>
    %15 = arith.mulf %10, %14 : vector<8x16xf32>
    %c0_7 = arith.constant 0 : index
    %c0_8 = arith.constant 0 : index
    %16 = vector.load %arg4[%c0_7, %c0_8] : memref<8x16xf32, #tpu.memory_space<vmem>>, vector<8x16xf32>
    tpu.vector_store %arg4[%c0_7, %c0_8], %15 {strides = array<i32>} : memref<8x16xf32, #tpu.memory_space<vmem>>, vector<8x16xf32>,
    return
  }
  func.func @transform_0(%arg0: i32) -> (i32, i32) {
    %c0_i32 = arith.constant 0 : i32
    %c0_i32_0 = arith.constant 0 : i32
    return %arg0, %c0_i32 : i32, i32
  }
  func.func @transform_1(%arg0: i32) -> (i32, i32) {
    %c0_i32 = arith.constant 0 : i32
    %c0_i32_0 = arith.constant 0 : i32
    %c0_i32_1 = arith.constant 0 : i32
    return %c0_i32, %c0_i32_0 : i32, i32
  }
  func.func @transform_2(%arg0: i32) -> (i32, i32) {
    %c0_i32 = arith.constant 0 : i32
    %c0_i32_0 = arith.constant 0 : i32
    %c0_i32_1 = arith.constant 0 : i32
    return %c0_i32, %c0_i32_0 : i32, i32
  }
  func.func @transform_3(%arg0: i32) -> (i32, i32) {
    %c0_i32 = arith.constant 0 : i32
    %c0_i32_0 = arith.constant 0 : i32
    return %arg0, %c0_i32 : i32, i32
  }
}

</mosaic_0001>

<bundles_post_ra>
// kernel: tpu_custom_call.1
= control target key start
LH: loop header
LB: loop body
LE: loop exit
PB: predicated region body
PF: predicated region fallthrough
CT: control target
= control target key end

     0   :  { %8 = vsyncpa [#allocation3], 0  ;;  %s339_s0 = inlined_call_operand.hbm [shape: f32[8,32], index: 0, kind: input, shape index: {}]   ;;  %s340_s1 = inlined_call_operand.hbm [shape: f32[16,32], index: 1, kind: input, shape index: {}]   ;;  %s341_s2 = inlined_call_operand.vmem [shape: f32[1,16], index: 2, kind: input, shape index: {}]   ;;  %s342_s3 = inlined_call_operand.hbm [shape: f32[8,16], index: 3, kind: output, shape index: {}]  }
   0x1   :  { %9 = vsyncpa [#allocation6], 0 }
   0x2   :  { %10 = vsyncpa [#allocation4], 0  ;;  %s262_s12 = smov [#allocation2]   ;;  %s263_s14 = smov [#allocation5]  }
   0x3   :  { %s17_s13 = sshll.u32 %s262_s12, 4  ;;  %s26_s15 = sshll.u32 %s263_s14, 4  ;;  %s18_s13 = int_to_ptr.vmem [resolvable:$true] %s17_s13  ;;  %s290_s15 = int_to_ptr.vmem [resolvable:$true] %s26_s15 }
   0x4   :  { %s190_s18 = scalar_lea.hbm %s339_s0, 128 }
   0x5   :  { %p191_p0 = scmp.ne.s32.totalorder %s339_s0, %s190_s18  ;;  %p194_p1 = scmp.lt.u32.totalorder %s190_s18, %s339_s0 }
   0x7   :  { %p196_p2 = pnand %p194_p1, %p191_p0 }
   0x9   :  { %199 = shalt.err (!%p196_p2)
}
   0xa   :  { %s200_s23 = scalar_lea.vmem %s18_s13, 128  ;;  %p205_p4 = scmp.lt.s32.totalorder %s18_s13, %s18_s13 }
   0xb   :  { %p201_p3 = scmp.ne.s32.totalorder %s18_s13, %s200_s23  ;;  %p206_p5 = scmp.lt.s32.totalorder %s200_s23, %s200_s23 }
   0xd   :  { %p207_p6 = por %p206_p5, %p205_p4 }
   0xf   :  { %p208_p7 = pnand %p207_p6, %p201_p3 }
  0x11   :  { %211 = shalt.err (!%p208_p7)
}
  0x12   :  { %20 = dma.hbm_to_vmem [thread:$0]  %s339_s0, 128, %s18_s13, [#allocation3]  }
  0x13   :  { %s212_s28 = scalar_lea.hbm %s340_s1, 256 }
  0x14   :  { %p213_p8 = scmp.ne.s32.totalorder %s340_s1, %s212_s28  ;;  %p216_p9 = scmp.lt.u32.totalorder %s212_s28, %s340_s1 }
  0x16   :  { %p218_p10 = pnand %p216_p9, %p213_p8 }
  0x18   :  { %221 = shalt.err (!%p218_p10)
}
  0x19   :  { %s222_s6 = scalar_lea.vmem %s290_s15, 256  ;;  %p227_p12 = scmp.lt.s32.totalorder %s290_s15, %s290_s15 }
  0x1a   :  { %p223_p11 = scmp.ne.s32.totalorder %s290_s15, %s222_s6  ;;  %p228_p13 = scmp.lt.s32.totalorder %s222_s6, %s222_s6 }
  0x1c   :  { %p229_p0 = por %p228_p13, %p227_p12 }
  0x1e   :  { %p230_p1 = pnand %p229_p0, %p223_p11 }
  0x20   :  { %233 = shalt.err (!%p230_p1)
}
  0x21   :  { %s264_s0 = smov 128   ;;  %s265_s7 = smov 8  }
  0x22   :  { %32 = dma.hbm_to_vmem [thread:$0]  %s340_s1, 256, %s290_s15, [#allocation6], %s264_s0, %s264_s0, %s265_s7  }
  0x23   :  { %256 = dma.done.wait [#allocation3], 128  }
  0x24   :  { %257 = vsyncadd [#allocation3], 4294967168 }
  0x25   :  { %258 = dma.done.wait [#allocation6], 256  }
  0x26   :  { %259 = vsyncadd [#allocation6], 4294967040  ;;  %v266_v0 = vmov 0.0|0.0   ;;  %vm267_vm0 = vmmov 0   ;;  %v268_v1 = vmov 0.0   ;;  %vm51_vm1 = vcmask 261120  }
  0x27   :  { %174 = vmatprep.subr.bf16.mxu0 %v266_v0  ;;  %171 = vmatprep.mubr.msk.f32.mxu0 %vm267_vm0, %v268_v1  ;;  %v42_v2 = vld [vmem:[#allocation5] sm:$0xff]  ;;  %v43_v3 = vld [vmem:[#allocation5 + $0x8] sm:$0xff]  ;;  %vm176_vm2 = vmpackc.low %vm51_vm1, %vm51_vm1  ;;  %vm131_vm3 = vcmask 130048   ;;  %s269_s1 = smov [#allocation7]  }
  0x28   :  { %v175_v4 = vpack.c.bf16 %v43_v3, %v42_v2  ;;  %v41_v5 = vld [vmem:[#allocation2] sm:$0xff]  ;;  %s150_s12 = sshll.u32 %s269_s1, 4  ;;  %s151_s12 = int_to_ptr.vmem [resolvable:$true] %s150_s12 }
  0x29   :  { %v160_v6 = vld [vmem:[%s341_s2] ss:$0 sm:$0xff]  ;;  %s234_s2 = scalar_lea.vmem %s151_s12, 128  ;;  %p239_p3 = scmp.lt.s32.totalorder %s151_s12, %s151_s12 }
  0x2a   :  { %177 = vmatpush3.bf16.xpose.msk.msra.mxu0 %vm176_vm2, %v175_v4  ;;  %p235_p2 = scmp.ne.s32.totalorder %s151_s12, %s234_s2  ;;  %p240_p4 = scmp.lt.s32.totalorder %s234_s2, %s234_s2 }
  0x2c   :  { %p241_p5 = por %p240_p4, %p239_p3 }
  0x2e   :  { %p242_p6 = pnand %p241_p5, %p235_p2 }
  0x31   :  { %172 = vmatmul.mubr.msk.f32.vlgmr.msra.gmra.mrb[0].mxu0 %vm51_vm1, %v41_v5 }
 0x104   :  { %v127_v7 = vpop.f32.mrb[0].mxu0 }
 0x105   :  { %v128_v8 = vadd.f32 %v160_v6, %v127_v7  ;;  %v173_v9 = vpop.f32.mrb[1].mxu0 }
 0x107   :  { %v132_v10 = vsel %vm131_vm3, %v128_v8, -inf }
 0x108   :  { %133 = vmax.xlane.f32.xlu0 %v132_v10 }
 0x195   :  { %v134_v11 = vpop.xlane.xlu0 %133 }
 0x196   :  { %v135_v12 = vsub.f32 %v128_v8, %v134_v11 }
 0x198   :  { %v136_v13 = vmul.f32 1.442695, %v135_v12 }
 0x19a   :  { %186 = vpow2.f32 %v136_v13 }
 0x1a4   :  { %v187_v14 = vpop.eup %186 }
 0x1a5   :  { %v138_v15 = vsel %vm131_vm3, %v187_v14, 0.0 }
 0x1a6   :  { %139 = vadd.xlane.f32.xlu0 %v138_v15 }
 0x233   :  { %v140_v16 = vpop.xlane.xlu0 %139 }
 0x234   :  { %188 = vrcp.f32 %v140_v16 }
 0x23e   :  { %v189_v17 = vpop.eup %188 }
 0x23f   :  { %v142_v18 = vmul.f32 %v189_v17, %v187_v14 }
 0x241   :  { %143 = vst.msk [vmem:[#allocation7] sm:$0xff] %vm131_vm3, %v142_v18 }
 0x242   :  { %245 = shalt.err (!%p242_p6)
}
 0x243   :  { %s246_s15 = scalar_lea.hbm %s342_s3, 128 }
 0x244   :  { %p247_p7 = scmp.ne.s32.totalorder %s342_s3, %s246_s15  ;;  %p250_p8 = scmp.lt.u32.totalorder %s246_s15, %s342_s3 }
 0x246   :  { %p252_p9 = pnand %p250_p8, %p247_p7 }
 0x248   :  { %255 = shalt.err (!%p252_p9)
}
 0x249   :  { %153 = dma.vmem_to_hbm [thread:$0]  %s151_s12, 128, %s342_s3, [#allocation4]  }
 0x24a   :  { %260 = dma.done.wait [#allocation4], 128  }
 0x24b   :  { %261 = vsyncadd [#allocation4], 4294967168 }
 0x24c   :  { %157 = vsyncpa [#allocation3], 1 }
 0x24d   :  { %158 = vsyncpa [#allocation6], 1 }
 0x24e   :  { %159 = vsyncpa [#allocation4], 1 }

</bundles_post_ra>
